<compile_context>
chip_gen: v7x
topology: tpu7x:2x2x1
jax: 0.10.0
libtpu: 0.0.40
codegen_flags: <defaults>
</compile_context>

<pallas_src>
import functools

import jax
import jax.numpy as jnp
from jax.experimental import pallas as pl
from jax.experimental.pallas import tpu as pltpu

_LANE = 128   # lane width (last dim)
_SUBLANE = 8  # sublane width (second-to-last dim)


def _round_up(n, m):
    return ((n + m - 1) // m) * m


def _classifier_kernel(x_ref, w_ref, b_ref, o_ref):
    # x_ref: [TB, Dp], w_ref: [Cp, Dp] (PyTorch Linear layout), b_ref: [1, Cp].
    # Contract the lane (feature) dim of both operands on the MXU, f32 accum.
    logits = jax.lax.dot_general(
        x_ref[...], w_ref[...],
        dimension_numbers=(((1,), (1,)), ((), ())),   # x[:, d] * w[:, d]
        preferred_element_type=jnp.float32,
    )
    logits = logits + b_ref[...].astype(jnp.float32)  # broadcast (1, Cp)
    o_ref[...] = jax.nn.sigmoid(logits).astype(o_ref.dtype)


@functools.partial(jax.jit, static_argnames=("block_b",))
def classifier_layer(x, weight, bias, *, block_b=None):
    """y = sigmoid(x @ weight.T + bias), matching torch.nn.Linear semantics.

    x:      [B, D]
    weight: [C, D]  (PyTorch Linear layout, no transpose needed)
    bias:   [C]
    returns [B, C]
    """
    B, D = x.shape
    C = weight.shape[0]

    # Pad feature / class dims to the lane width for dense MXU tiles and
    # lane-dense (unmasked) output stores.  Padded weight columns are zero, so
    # they contribute nothing to the contraction; padded output columns are
    # sliced off below.
    Dp = _round_up(D, _LANE)
    Cp = _round_up(C, _LANE)

    # Batch tile: multiple of the sublane width, capped so the double-buffered
    # x / out tiles plus the resident [Cp, Dp] weight stay well inside the
    # scoped-VMEM default on every generation (v7x has only 64 MiB physical).
    if block_b is None:
        block_b = min(512, _round_up(B, _SUBLANE))
    block_b = _round_up(block_b, _SUBLANE)
    Bp = _round_up(B, block_b)

    x_p = x if (Bp == B and Dp == D) else jnp.pad(x, ((0, Bp - B), (0, Dp - D)))
    w_p = weight if (Cp == C and Dp == D) else jnp.pad(
        weight, ((0, Cp - C), (0, Dp - D)))
    b_p = jnp.pad(bias, (0, Cp - C)).reshape(1, Cp)

    grid = (Bp // block_b,)

    out = pl.pallas_call(
        _classifier_kernel,
        out_shape=jax.ShapeDtypeStruct((Bp, Cp), x.dtype),
        grid_spec=pl.GridSpec(
            grid=grid,
            in_specs=[
                # x: one batch tile per grid step (double-buffered by Pallas).
                pl.BlockSpec((block_b, Dp), lambda i: (i, 0)),
                # weight / bias: same block every step -> stay VMEM-resident.
                pl.BlockSpec((Cp, Dp), lambda i: (0, 0)),
                pl.BlockSpec((1, Cp), lambda i: (0, 0)),
            ],
            out_specs=pl.BlockSpec((block_b, Cp), lambda i: (i, 0)),
        ),
        compiler_params=pltpu.CompilerParams(
            # Batch tiles are independent -> pipeline + megacore sharding.
            dimension_semantics=("parallel",),
        ),
    )(x_p, w_p, b_p)

    return out[:B, :C]


if __name__ == "__main__":
    # config.embedding_dim = 32, config.num_classes = 8, batch = 8
    B, D, C = 8, 32, 8
    key = jax.random.PRNGKey(0)
    kx, kw, kb = jax.random.split(key, 3)

    x = jax.random.normal(kx, (B, D), dtype=jnp.float32)
    # Deterministic "Linear" parameter init (Kaiming-uniform-like bound 1/sqrt(D))
    bound = 1.0 / jnp.sqrt(jnp.float32(D))
    weight = jax.random.uniform(kw, (C, D), dtype=jnp.float32,
                                minval=-bound, maxval=bound)
    bias = jax.random.uniform(kb, (C,), dtype=jnp.float32,
                              minval=-bound, maxval=bound)

    y = classifier_layer(x, weight, bias)
    jax.block_until_ready(y)

    # Reference check in plain JAX (f32 accumulation to match the kernel).
    y_ref = jax.nn.sigmoid(
        jax.lax.dot_general(x, weight,
                            dimension_numbers=(((1,), (1,)), ((), ())),
                            preferred_element_type=jnp.float32) + bias)
    assert y.shape == (B, C)
    assert jnp.allclose(y, y_ref, atol=1e-5, rtol=1e-5), "mismatch vs reference"

    print("KERNEL_OK")
</pallas_src>

<mosaic_0001>
module attributes {stable_mosaic.version = 11 : i64} {
  func.func @_classifier_kernel(%arg0: i32, %arg1: memref<8x128xf32, #tpu.memory_space<vmem>>, %arg2: memref<128x128xf32, #tpu.memory_space<vmem>>, %arg3: memref<1x128xf32, #tpu.memory_space<vmem>>, %arg4: memref<8x128xf32, #tpu.memory_space<vmem>>) attributes {dimension_semantics = [#tpu.dimension_semantics<parallel>], iteration_bounds = array<i64: 1>, scalar_prefetch = 0 : i64, scratch_operands = 0 : i64, tpu.core_type = #tpu.core_type<tc>, window_params = [{transform_indices = @transform_0, window_bounds = array<i64: 8, 128>}, {pipeline_mode = #tpu.pipeline_mode<synchronous>, transform_indices = @transform_1, window_bounds = array<i64: 128, 128>}, {pipeline_mode = #tpu.pipeline_mode<synchronous>, transform_indices = @transform_2, window_bounds = array<i64: 1, 128>}, {transform_indices = @transform_3, window_bounds = array<i64: 8, 128>}]} {
    %c0 = arith.constant 0 : index
    %c0_0 = arith.constant 0 : index
    %0 = vector.load %arg1[%c0, %c0_0] : memref<8x128xf32, #tpu.memory_space<vmem>>, vector<8x128xf32>
    %c0_1 = arith.constant 0 : index
    %c0_2 = arith.constant 0 : index
    %1 = vector.load %arg2[%c0_1, %c0_2] : memref<128x128xf32, #tpu.memory_space<vmem>>, vector<128x128xf32>
    %cst = arith.constant dense<0.000000e+00> : vector<8x128xf32>
    %2 = tpu.matmul %0, %1, %cst {dimension_numbers = #tpu.dot_dimension_numbers<[1], [1], [0], [0], [0, 0, 1, 0], [], []>} : vector<8x128xf32>, vector<128x128xf32>, vector<8x128xf32> -> vector<8x128xf32>
    %c0_3 = arith.constant 0 : index
    %c0_4 = arith.constant 0 : index
    %3 = vector.load %arg3[%c0_3, %c0_4] : memref<1x128xf32, #tpu.memory_space<vmem>>, vector<1x128xf32>
    %4 = vector.broadcast %3 : vector<1x128xf32> to vector<8x128xf32>
    %5 = arith.addf %2, %4 : vector<8x128xf32>
    %6 = arith.negf %5 : vector<8x128xf32>
    %7 = math.exp %6 : vector<8x128xf32>
    %cst_5 = arith.constant 1.000000e+00 : f32
    %8 = vector.broadcast %cst_5 : f32 to vector<8x128xf32>
    %9 = arith.addf %8, %7 : vector<8x128xf32>
    %10 = arith.divf %8, %9 : vector<8x128xf32>
    %c0_6 = arith.constant 0 : index
    %c0_7 = arith.constant 0 : index
    %11 = vector.load %arg4[%c0_6, %c0_7] : memref<8x128xf32, #tpu.memory_space<vmem>>, vector<8x128xf32>
    tpu.vector_store %arg4[%c0_6, %c0_7], %10 {strides = array<i32>} : memref<8x128xf32, #tpu.memory_space<vmem>>, vector<8x128xf32>,
    return
  }
  func.func @transform_0(%arg0: i32) -> (i32, i32) {
    %c0_i32 = arith.constant 0 : i32
    %c0_i32_0 = arith.constant 0 : i32
    return %arg0, %c0_i32 : i32, i32
  }
  func.func @transform_1(%arg0: i32) -> (i32, i32) {
    %c0_i32 = arith.constant 0 : i32
    %c0_i32_0 = arith.constant 0 : i32
    %c0_i32_1 = arith.constant 0 : i32
    return %c0_i32, %c0_i32_0 : i32, i32
  }
  func.func @transform_2(%arg0: i32) -> (i32, i32) {
    %c0_i32 = arith.constant 0 : i32
    %c0_i32_0 = arith.constant 0 : i32
    %c0_i32_1 = arith.constant 0 : i32
    return %c0_i32, %c0_i32_0 : i32, i32
  }
  func.func @transform_3(%arg0: i32) -> (i32, i32) {
    %c0_i32 = arith.constant 0 : i32
    %c0_i32_0 = arith.constant 0 : i32
    return %arg0, %c0_i32 : i32, i32
  }
}

</mosaic_0001>

<bundles_post_ra>
// kernel: classifier_layer.1
= control target key start
LH: loop header
LB: loop body
LE: loop exit
PB: predicated region body
PF: predicated region fallthrough
CT: control target
= control target key end

     0   :  { %v240_v2 = vmov 0.0|0.0   ;;  %vm241_vm0 = vmmov 0   ;;  %v242_v4 = vmov 0.0   ;;  %s330_s0 = inlined_call_operand.vmem [shape: f32[8,128], index: 0, kind: input, shape index: {}]   ;;  %s331_s1 = inlined_call_operand.vmem [shape: f32[128,128], index: 1, kind: input, shape index: {}]   ;;  %s332_s2 = inlined_call_operand.vmem [shape: f32[1,128], index: 2, kind: input, shape index: {}]   ;;  %s333_s3 = inlined_call_operand.hbm [shape: f32[8,128], index: 3, kind: output, shape index: {}]  }
   0x1   :  { %v16_v0 = vld [vmem:[%s331_s1] sm:$0xff]  ;;  %v17_v1 = vld [vmem:[%s331_s1 + $0x8] sm:$0xff]  ;;  %184 = vmatprep.subr.bf16.mxu0 %v240_v2  ;;  %181 = vmatprep.mubr.msk.f32.mxu0 %vm241_vm0, %v242_v4  ;;  %v18_v5 = vld [vmem:[%s331_s1 + $0x10] sm:$0xff] }
   0x2   :  { %v185_v3 = vpack.c.bf16 %v17_v1, %v16_v0  ;;  %v19_v6 = vld [vmem:[%s331_s1 + $0x18] sm:$0xff] }
   0x4   :  { %186 = vmatpush3.bf16.xpose.msra.mxu0 %v185_v3 }
   0x5   :  { %187 = vmatprep.subr.bf16.mxu0 %v240_v2 }
   0x6   :  { %8 = vsyncpa [#allocation3], 0  ;;  %v188_v7 = vpack.c.bf16 %v19_v6, %v18_v5  ;;  %v20_v8 = vld [vmem:[%s331_s1 + $0x20] sm:$0xff]  ;;  %v21_v9 = vld [vmem:[%s331_s1 + $0x28] sm:$0xff] }
   0x7   :  { %v191_v10 = vpack.c.bf16 %v21_v9, %v20_v8  ;;  %v22_v11 = vld [vmem:[%s331_s1 + $0x30] sm:$0xff]  ;;  %v23_v12 = vld [vmem:[%s331_s1 + $0x38] sm:$0xff]  ;;  %v24_v14 = vld [vmem:[%s331_s1 + $0x40] sm:$0xff] }
   0x8   :  { %v194_v13 = vpack.c.bf16 %v23_v12, %v22_v11  ;;  %v25_v15 = vld [vmem:[%s331_s1 + $0x48] sm:$0xff]  ;;  %v26_v17 = vld [vmem:[%s331_s1 + $0x50] sm:$0xff]  ;;  %v27_v18 = vld [vmem:[%s331_s1 + $0x58] sm:$0xff] }
   0x9   :  { %v197_v16 = vpack.c.bf16 %v25_v15, %v24_v14  ;;  %v200_v19 = vpack.c.bf16 %v27_v18, %v26_v17  ;;  %v28_v20 = vld [vmem:[%s331_s1 + $0x60] sm:$0xff]  ;;  %v29_v21 = vld [vmem:[%s331_s1 + $0x68] sm:$0xff]  ;;  %v30_v23 = vld [vmem:[%s331_s1 + $0x70] sm:$0xff] }
   0xa   :  { %v203_v22 = vpack.c.bf16 %v29_v21, %v28_v20  ;;  %v31_v24 = vld [vmem:[%s331_s1 + $0x78] sm:$0xff]  ;;  %v15_v26 = vld [vmem:[%s330_s0] sm:$0xff]  ;;  %s243_s1 = smov [#allocation2]  }
   0xb   :  { %v206_v25 = vpack.c.bf16 %v31_v24, %v30_v23  ;;  %v130_v27 = vld [vmem:[%s332_s2] ss:$0 sm:$0xff]  ;;  %s122_s21 = sshll.u32 %s243_s1, 4  ;;  %s123_s21 = int_to_ptr.vmem [resolvable:$true] %s122_s21 }
   0xc   :  { %189 = vmatpush3.bf16.xpose.msra.mxu0 %v188_v7  ;;  %s216_s22 = scalar_lea.vmem %s123_s21, 128  ;;  %p221_p1 = scmp.lt.s32.totalorder %s123_s21, %s123_s21 }
   0xd   :  { %190 = vmatprep.subr.bf16.mxu0 %v240_v2  ;;  %p217_p0 = scmp.ne.s32.totalorder %s123_s21, %s216_s22  ;;  %p222_p2 = scmp.lt.s32.totalorder %s216_s22, %s216_s22 }
   0xf   :  { %p223_p3 = por %p222_p2, %p221_p1 }
  0x11   :  { %p224_p4 = pnand %p223_p3, %p217_p0 }
  0x14   :  { %192 = vmatpush3.bf16.xpose.msra.mxu0 %v191_v10 }
  0x15   :  { %193 = vmatprep.subr.bf16.mxu0 %v240_v2 }
  0x1c   :  { %195 = vmatpush3.bf16.xpose.msra.mxu0 %v194_v13 }
  0x1d   :  { %196 = vmatprep.subr.bf16.mxu0 %v240_v2 }
  0x24   :  { %198 = vmatpush3.bf16.xpose.msra.mxu0 %v197_v16 }
  0x25   :  { %199 = vmatprep.subr.bf16.mxu0 %v240_v2 }
  0x2c   :  { %201 = vmatpush3.bf16.xpose.msra.mxu0 %v200_v19 }
  0x2d   :  { %202 = vmatprep.subr.bf16.mxu0 %v240_v2 }
  0x34   :  { %204 = vmatpush3.bf16.xpose.msra.mxu0 %v203_v22 }
  0x35   :  { %205 = vmatprep.subr.bf16.mxu0 %v240_v2 }
  0x3c   :  { %207 = vmatpush3.bf16.xpose.msra.mxu0 %v206_v25 }
  0x43   :  { %182 = vmatmul.mubr.f32.vlgmr.msra.gmra.mrb[0].mxu0 %v15_v26 }
 0x116   :  { %v105_v28 = vpop.f32.mrb[0].mxu0 }
 0x117   :  { %v106_v29 = vadd.f32 %v130_v27, %v105_v28  ;;  %v183_v30 = vpop.f32.mrb[1].mxu0 }
 0x119   :  { %v131_v31 = vmul.f32 -1.442695, %v106_v29 }
 0x11b   :  { %212 = vpow2.f32 %v131_v31 }
 0x125   :  { %v213_v32 = vpop.eup %212 }
 0x126   :  { %v112_v33 = vadd.f32 1.0, %v213_v32 }
 0x128   :  { %214 = vrcp.f32 %v112_v33 }
 0x132   :  { %v215_v34 = vpop.eup %214 }
 0x133   :  { %115 = vst [vmem:[#allocation2] sm:$0xff] %v215_v34 }
 0x134   :  { %227 = shalt.err (!%p224_p4)
}
 0x135   :  { %s228_s23 = scalar_lea.hbm %s333_s3, 128 }
 0x136   :  { %p229_p5 = scmp.ne.s32.totalorder %s333_s3, %s228_s23  ;;  %p232_p6 = scmp.lt.u32.totalorder %s228_s23, %s333_s3 }
 0x138   :  { %p234_p7 = pnand %p232_p6, %p229_p5 }
 0x13a   :  { %237 = shalt.err (!%p234_p7)
}
 0x13b   :  { %125 = dma.vmem_to_hbm [thread:$0]  %s123_s21, 128, %s333_s3, [#allocation3]  }
 0x13c   :  { %238 = dma.done.wait [#allocation3], 128  }
 0x13d   :  { %239 = vsyncadd [#allocation3], 4294967168 }
 0x13e   :  { %129 = vsyncpa [#allocation3], 1 }

</bundles_post_ra>
